<compile_context>
chip_gen: v7x
topology: tpu7x:2x2x1
jax: 0.10.0
libtpu: 0.0.40
codegen_flags: <defaults>
</compile_context>

<pallas_src>
import jax
import jax.numpy as jnp
from jax.experimental import pallas as pl
from jax.experimental.pallas import tpu as pltpu


def _dpda_kernel(p_ref, q_ref, np_row_ref, nq_col_ref, nq_row_ref, np_col_ref,
                 wp_top_ref, wp_bot_ref, bp_ref, wq_top_ref, wq_bot_ref, bq_ref,
                 pout_ref, qout_ref, pw_ref, qw_ref):
    P = p_ref[0]                        # (Lp, D) f32
    Q = q_ref[0]                        # (Lq, D) f32
    P16 = P.astype(jnp.bfloat16)        # MXU operands in bf16, f32 accumulation
    Q16 = Q.astype(jnp.bfloat16)

    # A = P @ Q^T (Lp, Lq); A^T recomputed as a second MXU dot (Q @ P^T)
    # instead of an XLU transpose.  Masks are pre-built additive biases.
    A = jax.lax.dot_general(P16, Q16, (((1,), (1,)), ((), ())),
                            preferred_element_type=jnp.float32)
    A = A + np_row_ref[0] + nq_col_ref[0]                     # (Lp, Lq)
    AT = jax.lax.dot_general(Q16, P16, (((1,), (1,)), ((), ())),
                             preferred_element_type=jnp.float32)
    AT = AT + nq_row_ref[0] + np_col_ref[0]                   # (Lq, Lp)

    # Row max doubles as p_weight / q_weight (torch: max over dim 2 / dim 1).
    m_p = jnp.max(A, axis=1, keepdims=True)                   # (Lp, 1)
    m_q = jnp.max(AT, axis=1, keepdims=True)                  # (Lq, 1)
    pw_ref[0] = m_p
    qw_ref[0] = m_q

    e_p = jnp.exp(A - m_p)
    e_q = jnp.exp(AT - m_q)
    A_q = (e_p / jnp.sum(e_p, axis=1, keepdims=True)).astype(jnp.bfloat16)
    A_p = (e_q / jnp.sum(e_q, axis=1, keepdims=True)).astype(jnp.bfloat16)

    P_q = jnp.dot(A_q, Q16, preferred_element_type=jnp.float32)   # (Lp, D)
    Q_p = jnp.dot(A_p, P16, preferred_element_type=jnp.float32)   # (Lq, D)
    Pq16 = P_q.astype(jnp.bfloat16)
    Qp16 = Q_p.astype(jnp.bfloat16)

    # torch: P_new = A_q @ cat([Q_p, Q], -1) = cat([A_q @ Q_p, P_q], -1)
    #        Q_new = A_p @ cat([P_q, P], -1) = cat([A_p @ P_q, Q_p], -1)
    # The concat is folded into the pre-split weight halves (no lane concat).
    P_qq = jnp.dot(A_q, Qp16, preferred_element_type=jnp.float32)  # (Lp, D)
    Q_pp = jnp.dot(A_p, Pq16, preferred_element_type=jnp.float32)  # (Lq, D)

    P2 = P + (jnp.dot(P_qq.astype(jnp.bfloat16), wp_top_ref[...],
                      preferred_element_type=jnp.float32)
              + jnp.dot(Pq16, wp_bot_ref[...],
                        preferred_element_type=jnp.float32)
              + bp_ref[...])
    Q2 = Q + (jnp.dot(Q_pp.astype(jnp.bfloat16), wq_top_ref[...],
                      preferred_element_type=jnp.float32)
              + jnp.dot(Qp16, wq_bot_ref[...],
                        preferred_element_type=jnp.float32)
              + bq_ref[...])

    # nn.LayerNorm(normalized_shape=[L, D], elementwise_affine=False), eps=1e-5:
    # normalize over the full (L, D) slab of each batch element.
    def layer_norm_2d(x):
        mu = jnp.mean(x)
        var = jnp.mean((x - mu) * (x - mu))
        return (x - mu) * jax.lax.rsqrt(var + 1e-5)

    pout_ref[0] = layer_norm_2d(P2)
    qout_ref[0] = layer_norm_2d(Q2)


def dpda_layer(P, Q, p_mask, q_mask, wp, bp, wq, bq):
    """One DPDALayear forward; whole per-batch-element compute in one kernel step."""
    B, Lp, D = P.shape
    Lq = Q.shape[1]

    pm = p_mask.astype(jnp.float32)
    qm = q_mask.astype(jnp.float32)
    np_row = ((1.0 - pm) * -10000.0).reshape(B, Lp, 1)
    np_col = ((1.0 - pm) * -10000.0).reshape(B, 1, Lp)
    nq_row = ((1.0 - qm) * -10000.0).reshape(B, Lq, 1)
    nq_col = ((1.0 - qm) * -10000.0).reshape(B, 1, Lq)

    # torch Linear(2D, D): y = x @ W.T + b.  Pre-transpose and pre-split into
    # the two (D, D) halves that multiply the [A_q@Q_p | A_q@Q] concat parts.
    wpT = wp.T.astype(jnp.bfloat16)      # (2D, D)
    wqT = wq.T.astype(jnp.bfloat16)
    wp_top, wp_bot = wpT[:D], wpT[D:]
    wq_top, wq_bot = wqT[:D], wqT[D:]
    bp2 = bp.reshape(1, D).astype(jnp.float32)
    bq2 = bq.reshape(1, D).astype(jnp.float32)

    out_shapes = (
        jax.ShapeDtypeStruct((B, Lp, D), jnp.float32),   # P_out
        jax.ShapeDtypeStruct((B, Lq, D), jnp.float32),   # Q_out
        jax.ShapeDtypeStruct((B, Lp, 1), jnp.float32),   # p_weight
        jax.ShapeDtypeStruct((B, Lq, 1), jnp.float32),   # q_weight
    )
    grid_spec = pltpu.PrefetchScalarGridSpec(
        num_scalar_prefetch=0,
        grid=(B,),
        in_specs=[
            pl.BlockSpec((1, Lp, D), lambda b: (b, 0, 0)),
            pl.BlockSpec((1, Lq, D), lambda b: (b, 0, 0)),
            pl.BlockSpec((1, Lp, 1), lambda b: (b, 0, 0)),
            pl.BlockSpec((1, 1, Lq), lambda b: (b, 0, 0)),
            pl.BlockSpec((1, Lq, 1), lambda b: (b, 0, 0)),
            pl.BlockSpec((1, 1, Lp), lambda b: (b, 0, 0)),
            pl.BlockSpec((D, D), lambda b: (0, 0)),
            pl.BlockSpec((D, D), lambda b: (0, 0)),
            pl.BlockSpec((1, D), lambda b: (0, 0)),
            pl.BlockSpec((D, D), lambda b: (0, 0)),
            pl.BlockSpec((D, D), lambda b: (0, 0)),
            pl.BlockSpec((1, D), lambda b: (0, 0)),
        ],
        out_specs=[
            pl.BlockSpec((1, Lp, D), lambda b: (b, 0, 0)),
            pl.BlockSpec((1, Lq, D), lambda b: (b, 0, 0)),
            pl.BlockSpec((1, Lp, 1), lambda b: (b, 0, 0)),
            pl.BlockSpec((1, Lq, 1), lambda b: (b, 0, 0)),
        ],
    )
    Pout, Qout, pw, qw = pl.pallas_call(
        _dpda_kernel,
        out_shape=out_shapes,
        grid_spec=grid_spec,
        compiler_params=pltpu.CompilerParams(dimension_semantics=("parallel",)),
    )(P.astype(jnp.float32), Q.astype(jnp.float32),
      np_row, nq_col, nq_row, np_col,
      wp_top, wp_bot, bp2, wq_top, wq_bot, bq2)
    return Pout, Qout, pw[..., 0], qw[..., 0]


def cross_attention(q, o, mask_q, mask_o, params, layer_num):
    """Crossattention.forward: returns (q_max, o_max, Q, O, q_weight, o_weight).

    The torch loop calls every (weight-identical, deepcopied) layer with the
    ORIGINAL (q, o) and keeps only the last result, so a single layer
    evaluation is exactly equivalent to running `layer_num` of them.
    """
    assert layer_num >= 1
    wp, bp, wq, bq = params
    Qo, Oo, q_weight, o_weight = dpda_layer(q, o, mask_q, mask_o, wp, bp, wq, bq)
    # Crossattention tail: per-batch max over the sequence axis (done in the
    # wrapper — trivial fused XLA reduce, avoids two tiny masked-store outputs).
    q_max = jnp.max(Qo, axis=1)
    o_max = jnp.max(Oo, axis=1)
    return q_max, o_max, Qo, Oo, q_weight, o_weight


# ------------------------- pure-JAX references -------------------------
def _ref_dpda_bf16(P, Q, p_mask, q_mask, wp, bp, wq, bq):
    """Mirror of the kernel algorithm (same bf16 MXU operand casts, f32 acc)."""
    D = P.shape[-1]
    P16 = P.astype(jnp.bfloat16)
    Q16 = Q.astype(jnp.bfloat16)
    wpT = wp.T.astype(jnp.bfloat16)
    wqT = wq.T.astype(jnp.bfloat16)
    np_row = ((1.0 - p_mask) * -10000.0)[:, :, None]
    np_col = ((1.0 - p_mask) * -10000.0)[:, None, :]
    nq_row = ((1.0 - q_mask) * -10000.0)[:, :, None]
    nq_col = ((1.0 - q_mask) * -10000.0)[:, None, :]

    A = jnp.einsum('bpd,bqd->bpq', P16, Q16,
                   preferred_element_type=jnp.float32) + np_row + nq_col
    AT = jnp.einsum('bqd,bpd->bqp', Q16, P16,
                    preferred_element_type=jnp.float32) + nq_row + np_col
    p_weight = jnp.max(A, axis=2)
    q_weight = jnp.max(AT, axis=2)
    e_p = jnp.exp(A - p_weight[:, :, None])
    e_q = jnp.exp(AT - q_weight[:, :, None])
    A_q = (e_p / jnp.sum(e_p, axis=2, keepdims=True)).astype(jnp.bfloat16)
    A_p = (e_q / jnp.sum(e_q, axis=2, keepdims=True)).astype(jnp.bfloat16)
    P_q = jnp.einsum('bpq,bqd->bpd', A_q, Q16, preferred_element_type=jnp.float32)
    Q_p = jnp.einsum('bqp,bpd->bqd', A_p, P16, preferred_element_type=jnp.float32)
    P_qq = jnp.einsum('bpq,bqd->bpd', A_q, Q_p.astype(jnp.bfloat16),
                      preferred_element_type=jnp.float32)
    Q_pp = jnp.einsum('bqp,bpd->bqd', A_p, P_q.astype(jnp.bfloat16),
                      preferred_element_type=jnp.float32)
    P2 = P + (jnp.einsum('bpk,kd->bpd', P_qq.astype(jnp.bfloat16), wpT[:D],
                         preferred_element_type=jnp.float32)
              + jnp.einsum('bpk,kd->bpd', P_q.astype(jnp.bfloat16), wpT[D:],
                           preferred_element_type=jnp.float32) + bp)
    Q2 = Q + (jnp.einsum('bqk,kd->bqd', Q_pp.astype(jnp.bfloat16), wqT[:D],
                         preferred_element_type=jnp.float32)
              + jnp.einsum('bqk,kd->bqd', Q_p.astype(jnp.bfloat16), wqT[D:],
                           preferred_element_type=jnp.float32) + bq)

    def ln(x):
        mu = jnp.mean(x, axis=(1, 2), keepdims=True)
        var = jnp.mean((x - mu) ** 2, axis=(1, 2), keepdims=True)
        return (x - mu) / jnp.sqrt(var + 1e-5)

    return ln(P2), ln(Q2), p_weight, q_weight


def _ref_dpda_f32(P, Q, p_mask, q_mask, wp, bp, wq, bq):
    """Exact f32 reference of the torch math (precision scoped per-op, no global config)."""
    hi = jax.lax.Precision.HIGHEST
    A = jnp.einsum('bpd,bqd->bpq', P, Q, precision=hi)
    A = A + ((1.0 - p_mask) * -10000.0)[:, :, None]
    A = A + ((1.0 - q_mask) * -10000.0)[:, None, :]
    p_weight = jnp.max(A, axis=2)
    q_weight = jnp.max(A, axis=1)
    A_q = jax.nn.softmax(A, axis=2)
    A_p = jax.nn.softmax(jnp.swapaxes(A, 1, 2), axis=2)
    P_q = jnp.einsum('bpq,bqd->bpd', A_q, Q, precision=hi)
    Q_p = jnp.einsum('bqp,bpd->bqd', A_p, P, precision=hi)
    P_t = jnp.concatenate([P_q, P], axis=2)
    Q_t = jnp.concatenate([Q_p, Q], axis=2)
    Qn = jnp.einsum('bqp,bpk->bqk', A_p, P_t, precision=hi)
    Pn = jnp.einsum('bpq,bqk->bpk', A_q, Q_t, precision=hi)
    P2 = P + (jnp.einsum('bpk,dk->bpd', Pn, wp, precision=hi) + bp)
    Q2 = Q + (jnp.einsum('bqk,dk->bqd', Qn, wq, precision=hi) + bq)

    def ln(x):
        mu = jnp.mean(x, axis=(1, 2), keepdims=True)
        var = jnp.mean((x - mu) ** 2, axis=(1, 2), keepdims=True)
        return (x - mu) / jnp.sqrt(var + 1e-5)

    return ln(P2), ln(Q2), p_weight, q_weight


if __name__ == "__main__":
    B, Lq_len, Lo_len, D, layer_num = 2, 8, 16, 32, 2

    key = jax.random.PRNGKey(0)
    ks = jax.random.split(key, 6)
    q = jax.random.normal(ks[0], (B, Lq_len, D), jnp.float32)
    o = jax.random.normal(ks[1], (B, Lo_len, D), jnp.float32)
    # PyTorch Linear(2*dim, dim) parameter shapes.
    wp = jax.random.normal(ks[2], (D, 2 * D), jnp.float32) * 0.1   # W_p.weight
    bp = jax.random.normal(ks[3], (D,), jnp.float32) * 0.1         # W_p.bias
    wq = jax.random.normal(ks[4], (D, 2 * D), jnp.float32) * 0.1   # W_q.weight
    bq = jax.random.normal(ks[5], (D,), jnp.float32) * 0.1         # W_q.bias

    lens_q = jnp.array([Lq_len, 5])
    lens_o = jnp.array([Lo_len, 11])
    mask_q = (jnp.arange(Lq_len)[None, :] < lens_q[:, None]).astype(jnp.float32)
    mask_o = (jnp.arange(Lo_len)[None, :] < lens_o[:, None]).astype(jnp.float32)

    fn = jax.jit(lambda q, o, mq, mo: cross_attention(
        q, o, mq, mo, (wp, bp, wq, bq), layer_num))
    outs = jax.block_until_ready(fn(q, o, mask_q, mask_o))

    # Tight check vs a pure-JAX mirror of the same bf16-MXU algorithm.
    Pr, Qr, pw_r, qw_r = _ref_dpda_bf16(q, o, mask_q, mask_o, wp, bp, wq, bq)
    ref = (jnp.max(Pr, axis=1), jnp.max(Qr, axis=1), Pr, Qr, pw_r, qw_r)
    for got, want in zip(outs, ref):
        err = float(jnp.max(jnp.abs(got - want)))
        assert jnp.allclose(got, want, rtol=2e-3, atol=2e-3), err

    # Coarse sanity check vs the exact f32 torch math (bounds the bf16-MXU
    # approximation error at these shapes).
    Pf, Qf, pw_f, qw_f = _ref_dpda_f32(q, o, mask_q, mask_o, wp, bp, wq, bq)
    ref32 = (jnp.max(Pf, axis=1), jnp.max(Qf, axis=1), Pf, Qf, pw_f, qw_f)
    for got, want in zip(outs, ref32):
        err = float(jnp.max(jnp.abs(got - want)))
        assert err < 0.2, err

    print("KERNEL_OK")
</pallas_src>

<mosaic_0001>
module attributes {stable_mosaic.version = 11 : i64} {
  func.func @_dpda_kernel(%arg0: i32, %arg1: memref<1x8x32xf32, #tpu.memory_space<vmem>>, %arg2: memref<1x16x32xf32, #tpu.memory_space<vmem>>, %arg3: memref<1x8x1xf32, #tpu.memory_space<vmem>>, %arg4: memref<1x1x16xf32, #tpu.memory_space<vmem>>, %arg5: memref<1x16x1xf32, #tpu.memory_space<vmem>>, %arg6: memref<1x1x8xf32, #tpu.memory_space<vmem>>, %arg7: memref<32x32xbf16, #tpu.memory_space<vmem>>, %arg8: memref<32x32xbf16, #tpu.memory_space<vmem>>, %arg9: memref<1x32xf32, #tpu.memory_space<vmem>>, %arg10: memref<32x32xbf16, #tpu.memory_space<vmem>>, %arg11: memref<32x32xbf16, #tpu.memory_space<vmem>>, %arg12: memref<1x32xf32, #tpu.memory_space<vmem>>, %arg13: memref<1x8x32xf32, #tpu.memory_space<vmem>>, %arg14: memref<1x16x32xf32, #tpu.memory_space<vmem>>, %arg15: memref<1x8x1xf32, #tpu.memory_space<vmem>>, %arg16: memref<1x16x1xf32, #tpu.memory_space<vmem>>) attributes {dimension_semantics = [#tpu.dimension_semantics<parallel>], iteration_bounds = array<i64: 2>, scalar_prefetch = 0 : i64, scratch_operands = 0 : i64, tpu.core_type = #tpu.core_type<tc>, window_params = [{transform_indices = @transform_0, window_bounds = array<i64: 1, 8, 32>}, {transform_indices = @transform_1, window_bounds = array<i64: 1, 16, 32>}, {transform_indices = @transform_2, window_bounds = array<i64: 1, 8, 1>}, {transform_indices = @transform_3, window_bounds = array<i64: 1, 1, 16>}, {transform_indices = @transform_4, window_bounds = array<i64: 1, 16, 1>}, {transform_indices = @transform_5, window_bounds = array<i64: 1, 1, 8>}, {pipeline_mode = #tpu.pipeline_mode<synchronous>, transform_indices = @transform_6, window_bounds = array<i64: 32, 32>}, {pipeline_mode = #tpu.pipeline_mode<synchronous>, transform_indices = @transform_7, window_bounds = array<i64: 32, 32>}, {pipeline_mode = #tpu.pipeline_mode<synchronous>, transform_indices = @transform_8, window_bounds = array<i64: 1, 32>}, {pipeline_mode = #tpu.pipeline_mode<synchronous>, transform_indices = @transform_9, window_bounds = array<i64: 32, 32>}, {pipeline_mode = #tpu.pipeline_mode<synchronous>, transform_indices = @transform_10, window_bounds = array<i64: 32, 32>}, {pipeline_mode = #tpu.pipeline_mode<synchronous>, transform_indices = @transform_11, window_bounds = array<i64: 1, 32>}, {transform_indices = @transform_12, window_bounds = array<i64: 1, 8, 32>}, {transform_indices = @transform_13, window_bounds = array<i64: 1, 16, 32>}, {transform_indices = @transform_14, window_bounds = array<i64: 1, 8, 1>}, {transform_indices = @transform_15, window_bounds = array<i64: 1, 16, 1>}]} {
    %c0 = arith.constant 0 : index
    %c0_0 = arith.constant 0 : index
    %c0_1 = arith.constant 0 : index
    %0 = vector.load %arg1[%c0, %c0_0, %c0_1] : memref<1x8x32xf32, #tpu.memory_space<vmem>>, vector<1x8x32xf32>
    %1 = vector.shape_cast %0 : vector<1x8x32xf32> to vector<8x32xf32>
    %c0_2 = arith.constant 0 : index
    %c0_3 = arith.constant 0 : index
    %c0_4 = arith.constant 0 : index
    %2 = vector.load %arg2[%c0_2, %c0_3, %c0_4] : memref<1x16x32xf32, #tpu.memory_space<vmem>>, vector<1x16x32xf32>
    %3 = vector.shape_cast %2 : vector<1x16x32xf32> to vector<16x32xf32>
    %4 = arith.truncf %1 : vector<8x32xf32> to vector<8x32xbf16>
    %5 = arith.truncf %3 : vector<16x32xf32> to vector<16x32xbf16>
    %cst = arith.constant dense<0.000000e+00> : vector<8x16xf32>
    %6 = tpu.matmul %4, %5, %cst {dimension_numbers = #tpu.dot_dimension_numbers<[1], [1], [0], [0], [0, 0, 1, 0], [], []>} : vector<8x32xbf16>, vector<16x32xbf16>, vector<8x16xf32> -> vector<8x16xf32>
    %c0_5 = arith.constant 0 : index
    %c0_6 = arith.constant 0 : index
    %c0_7 = arith.constant 0 : index
    %7 = vector.load %arg3[%c0_5, %c0_6, %c0_7] : memref<1x8x1xf32, #tpu.memory_space<vmem>>, vector<1x8x1xf32>
    %8 = vector.shape_cast %7 : vector<1x8x1xf32> to vector<8x1xf32>
    %9 = vector.broadcast %8 : vector<8x1xf32> to vector<8x16xf32>
    %10 = arith.addf %6, %9 : vector<8x16xf32>
    %c0_8 = arith.constant 0 : index
    %c0_9 = arith.constant 0 : index
    %c0_10 = arith.constant 0 : index
    %11 = vector.load %arg4[%c0_8, %c0_9, %c0_10] : memref<1x1x16xf32, #tpu.memory_space<vmem>>, vector<1x1x16xf32>
    %12 = vector.shape_cast %11 : vector<1x1x16xf32> to vector<1x16xf32>
    %13 = vector.broadcast %12 : vector<1x16xf32> to vector<8x16xf32>
    %14 = arith.addf %10, %13 : vector<8x16xf32>
    %cst_11 = arith.constant dense<0.000000e+00> : vector<16x8xf32>
    %15 = tpu.matmul %5, %4, %cst_11 {dimension_numbers = #tpu.dot_dimension_numbers<[1], [1], [0], [0], [0, 0, 1, 0], [], []>} : vector<16x32xbf16>, vector<8x32xbf16>, vector<16x8xf32> -> vector<16x8xf32>
    %c0_12 = arith.constant 0 : index
    %c0_13 = arith.constant 0 : index
    %c0_14 = arith.constant 0 : index
    %16 = vector.load %arg5[%c0_12, %c0_13, %c0_14] : memref<1x16x1xf32, #tpu.memory_space<vmem>>, vector<1x16x1xf32>
    %17 = vector.shape_cast %16 : vector<1x16x1xf32> to vector<16x1xf32>
    %18 = vector.broadcast %17 : vector<16x1xf32> to vector<16x8xf32>
    %19 = arith.addf %15, %18 : vector<16x8xf32>
    %c0_15 = arith.constant 0 : index
    %c0_16 = arith.constant 0 : index
    %c0_17 = arith.constant 0 : index
    %20 = vector.load %arg6[%c0_15, %c0_16, %c0_17] : memref<1x1x8xf32, #tpu.memory_space<vmem>>, vector<1x1x8xf32>
    %21 = vector.shape_cast %20 : vector<1x1x8xf32> to vector<1x8xf32>
    %22 = vector.broadcast %21 : vector<1x8xf32> to vector<16x8xf32>
    %23 = arith.addf %19, %22 : vector<16x8xf32>
    %cst_18 = arith.constant dense<0xFF800000> : vector<8xf32>
    %24 = vector.multi_reduction <maximumf>, %14, %cst_18 [1] : vector<8x16xf32> to vector<8xf32>
    %25 = vector.shape_cast %24 : vector<8xf32> to vector<8x1xf32>
    %cst_19 = arith.constant dense<0xFF800000> : vector<16xf32>
    %26 = vector.multi_reduction <maximumf>, %23, %cst_19 [1] : vector<16x8xf32> to vector<16xf32>
    %27 = vector.shape_cast %26 : vector<16xf32> to vector<16x1xf32>
    %c0_20 = arith.constant 0 : index
    %c0_21 = arith.constant 0 : index
    %c0_22 = arith.constant 0 : index
    %28 = vector.load %arg15[%c0_20, %c0_21, %c0_22] : memref<1x8x1xf32, #tpu.memory_space<vmem>>, vector<1x8x1xf32>
    %29 = vector.shape_cast %28 : vector<1x8x1xf32> to vector<8x1xf32>
    %30 = vector.shape_cast %25 : vector<8x1xf32> to vector<1x8x1xf32>
    tpu.vector_store %arg15[%c0_20, %c0_21, %c0_22], %30 {strides = array<i32>} : memref<1x8x1xf32, #tpu.memory_space<vmem>>, vector<1x8x1xf32>,
    %c0_23 = arith.constant 0 : index
    %c0_24 = arith.constant 0 : index
    %c0_25 = arith.constant 0 : index
    %31 = vector.load %arg16[%c0_23, %c0_24, %c0_25] : memref<1x16x1xf32, #tpu.memory_space<vmem>>, vector<1x16x1xf32>
    %32 = vector.shape_cast %31 : vector<1x16x1xf32> to vector<16x1xf32>
    %33 = vector.shape_cast %27 : vector<16x1xf32> to vector<1x16x1xf32>
    tpu.vector_store %arg16[%c0_23, %c0_24, %c0_25], %33 {strides = array<i32>} : memref<1x16x1xf32, #tpu.memory_space<vmem>>, vector<1x16x1xf32>,
    %34 = vector.broadcast %25 : vector<8x1xf32> to vector<8x16xf32>
    %35 = arith.subf %14, %34 : vector<8x16xf32>
    %36 = math.exp %35 : vector<8x16xf32>
    %37 = vector.broadcast %27 : vector<16x1xf32> to vector<16x8xf32>
    %38 = arith.subf %23, %37 : vector<16x8xf32>
    %39 = math.exp %38 : vector<16x8xf32>
    %cst_26 = arith.constant dense<0.000000e+00> : vector<8xf32>
    %40 = vector.multi_reduction <add>, %36, %cst_26 [1] : vector<8x16xf32> to vector<8xf32>
    %41 = vector.shape_cast %40 : vector<8xf32> to vector<8x1xf32>
    %42 = vector.broadcast %41 : vector<8x1xf32> to vector<8x16xf32>
    %43 = arith.divf %36, %42 : vector<8x16xf32>
    %44 = arith.truncf %43 : vector<8x16xf32> to vector<8x16xbf16>
    %cst_27 = arith.constant dense<0.000000e+00> : vector<16xf32>
    %45 = vector.multi_reduction <add>, %39, %cst_27 [1] : vector<16x8xf32> to vector<16xf32>
    %46 = vector.shape_cast %45 : vector<16xf32> to vector<16x1xf32>
    %47 = vector.broadcast %46 : vector<16x1xf32> to vector<16x8xf32>
    %48 = arith.divf %39, %47 : vector<16x8xf32>
    %49 = arith.truncf %48 : vector<16x8xf32> to vector<16x8xbf16>
    %cst_28 = arith.constant dense<0.000000e+00> : vector<8x32xf32>
    %50 = tpu.matmul %44, %5, %cst_28 {dimension_numbers = #tpu.dot_dimension_numbers<[1], [0], [0], [1], [0, 0, 1, 1], [], []>} : vector<8x16xbf16>, vector<16x32xbf16>, vector<8x32xf32> -> vector<8x32xf32>
    %cst_29 = arith.constant dense<0.000000e+00> : vector<16x32xf32>
    %51 = tpu.matmul %49, %4, %cst_29 {dimension_numbers = #tpu.dot_dimension_numbers<[1], [0], [0], [1], [0, 0, 1, 1], [], []>} : vector<16x8xbf16>, vector<8x32xbf16>, vector<16x32xf32> -> vector<16x32xf32>
    %52 = arith.truncf %50 : vector<8x32xf32> to vector<8x32xbf16>
    %53 = arith.truncf %51 : vector<16x32xf32> to vector<16x32xbf16>
    %cst_30 = arith.constant dense<0.000000e+00> : vector<8x32xf32>
    %54 = tpu.matmul %44, %53, %cst_30 {dimension_numbers = #tpu.dot_dimension_numbers<[1], [0], [0], [1], [0, 0, 1, 1], [], []>} : vector<8x16xbf16>, vector<16x32xbf16>, vector<8x32xf32> -> vector<8x32xf32>
    %cst_31 = arith.constant dense<0.000000e+00> : vector<16x32xf32>
    %55 = tpu.matmul %49, %52, %cst_31 {dimension_numbers = #tpu.dot_dimension_numbers<[1], [0], [0], [1], [0, 0, 1, 1], [], []>} : vector<16x8xbf16>, vector<8x32xbf16>, vector<16x32xf32> -> vector<16x32xf32>
    %56 = arith.truncf %54 : vector<8x32xf32> to vector<8x32xbf16>
    %c0_32 = arith.constant 0 : index
    %c0_33 = arith.constant 0 : index
    %57 = vector.load %arg7[%c0_32, %c0_33] : memref<32x32xbf16, #tpu.memory_space<vmem>>, vector<32x32xbf16>
    %cst_34 = arith.constant dense<0.000000e+00> : vector<8x32xf32>
    %58 = tpu.matmul %56, %57, %cst_34 {dimension_numbers = #tpu.dot_dimension_numbers<[1], [0], [0], [1], [0, 0, 1, 1], [], []>} : vector<8x32xbf16>, vector<32x32xbf16>, vector<8x32xf32> -> vector<8x32xf32>
    %c0_35 = arith.constant 0 : index
    %c0_36 = arith.constant 0 : index
    %59 = vector.load %arg8[%c0_35, %c0_36] : memref<32x32xbf16, #tpu.memory_space<vmem>>, vector<32x32xbf16>
    %cst_37 = arith.constant dense<0.000000e+00> : vector<8x32xf32>
    %60 = tpu.matmul %52, %59, %cst_37 {dimension_numbers = #tpu.dot_dimension_numbers<[1], [0], [0], [1], [0, 0, 1, 1], [], []>} : vector<8x32xbf16>, vector<32x32xbf16>, vector<8x32xf32> -> vector<8x32xf32>
    %61 = arith.addf %58, %60 : vector<8x32xf32>
    %c0_38 = arith.constant 0 : index
    %c0_39 = arith.constant 0 : index
    %62 = vector.load %arg9[%c0_38, %c0_39] : memref<1x32xf32, #tpu.memory_space<vmem>>, vector<1x32xf32>
    %63 = vector.broadcast %62 : vector<1x32xf32> to vector<8x32xf32>
    %64 = arith.addf %61, %63 : vector<8x32xf32>
    %65 = arith.addf %1, %64 : vector<8x32xf32>
    %66 = arith.truncf %55 : vector<16x32xf32> to vector<16x32xbf16>
    %c0_40 = arith.constant 0 : index
    %c0_41 = arith.constant 0 : index
    %67 = vector.load %arg10[%c0_40, %c0_41] : memref<32x32xbf16, #tpu.memory_space<vmem>>, vector<32x32xbf16>
    %cst_42 = arith.constant dense<0.000000e+00> : vector<16x32xf32>
    %68 = tpu.matmul %66, %67, %cst_42 {dimension_numbers = #tpu.dot_dimension_numbers<[1], [0], [0], [1], [0, 0, 1, 1], [], []>} : vector<16x32xbf16>, vector<32x32xbf16>, vector<16x32xf32> -> vector<16x32xf32>
    %c0_43 = arith.constant 0 : index
    %c0_44 = arith.constant 0 : index
    %69 = vector.load %arg11[%c0_43, %c0_44] : memref<32x32xbf16, #tpu.memory_space<vmem>>, vector<32x32xbf16>
    %cst_45 = arith.constant dense<0.000000e+00> : vector<16x32xf32>
    %70 = tpu.matmul %53, %69, %cst_45 {dimension_numbers = #tpu.dot_dimension_numbers<[1], [0], [0], [1], [0, 0, 1, 1], [], []>} : vector<16x32xbf16>, vector<32x32xbf16>, vector<16x32xf32> -> vector<16x32xf32>
    %71 = arith.addf %68, %70 : vector<16x32xf32>
    %c0_46 = arith.constant 0 : index
    %c0_47 = arith.constant 0 : index
    %72 = vector.load %arg12[%c0_46, %c0_47] : memref<1x32xf32, #tpu.memory_space<vmem>>, vector<1x32xf32>
    %73 = vector.broadcast %72 : vector<1x32xf32> to vector<16x32xf32>
    %74 = arith.addf %71, %73 : vector<16x32xf32>
    %75 = arith.addf %3, %74 : vector<16x32xf32>
    %76 = vector.shape_cast %65 : vector<8x32xf32> to vector<1x8x32xf32>
    %cst_48 = arith.constant dense<0.000000e+00> : vector<1xf32>
    %77 = vector.multi_reduction <add>, %76, %cst_48 [1, 2] : vector<1x8x32xf32> to vector<1xf32>
    %78 = vector.shape_cast %77 : vector<1xf32> to vector<1x1x1xf32>
    %79 = vector.extract %78[0, 0, 0] : f32 from vector<1x1x1xf32>
    %cst_49 = arith.constant 2.560000e+02 : f32
    %80 = arith.divf %79, %cst_49 : f32
    %81 = vector.broadcast %80 : f32 to vector<8x32xf32>
    %82 = arith.subf %65, %81 : vector<8x32xf32>
    %83 = vector.broadcast %80 : f32 to vector<8x32xf32>
    %84 = arith.subf %65, %83 : vector<8x32xf32>
    %85 = arith.mulf %82, %84 : vector<8x32xf32>
    %86 = vector.shape_cast %85 : vector<8x32xf32> to vector<1x8x32xf32>
    %cst_50 = arith.constant dense<0.000000e+00> : vector<1xf32>
    %87 = vector.multi_reduction <add>, %86, %cst_50 [1, 2] : vector<1x8x32xf32> to vector<1xf32>
    %88 = vector.shape_cast %87 : vector<1xf32> to vector<1x1x1xf32>
    %89 = vector.extract %88[0, 0, 0] : f32 from vector<1x1x1xf32>
    %cst_51 = arith.constant 2.560000e+02 : f32
    %90 = arith.divf %89, %cst_51 : f32
    %91 = vector.broadcast %80 : f32 to vector<8x32xf32>
    %92 = arith.subf %65, %91 : vector<8x32xf32>
    %cst_52 = arith.constant 9.99999974E-6 : f32
    %93 = arith.addf %90, %cst_52 : f32
    %94 = math.rsqrt %93 : f32
    %95 = vector.broadcast %94 : f32 to vector<8x32xf32>
    %96 = arith.mulf %92, %95 : vector<8x32xf32>
    %c0_53 = arith.constant 0 : index
    %c0_54 = arith.constant 0 : index
    %c0_55 = arith.constant 0 : index
    %97 = vector.load %arg13[%c0_53, %c0_54, %c0_55] : memref<1x8x32xf32, #tpu.memory_space<vmem>>, vector<1x8x32xf32>
    %98 = vector.shape_cast %97 : vector<1x8x32xf32> to vector<8x32xf32>
    %99 = vector.shape_cast %96 : vector<8x32xf32> to vector<1x8x32xf32>
    tpu.vector_store %arg13[%c0_53, %c0_54, %c0_55], %99 {strides = array<i32>} : memref<1x8x32xf32, #tpu.memory_space<vmem>>, vector<1x8x32xf32>,
    %100 = vector.shape_cast %75 : vector<16x32xf32> to vector<1x16x32xf32>
    %cst_56 = arith.constant dense<0.000000e+00> : vector<1xf32>
    %101 = vector.multi_reduction <add>, %100, %cst_56 [1, 2] : vector<1x16x32xf32> to vector<1xf32>
    %102 = vector.shape_cast %101 : vector<1xf32> to vector<1x1x1xf32>
    %103 = vector.extract %102[0, 0, 0] : f32 from vector<1x1x1xf32>
    %cst_57 = arith.constant 5.120000e+02 : f32
    %104 = arith.divf %103, %cst_57 : f32
    %105 = vector.broadcast %104 : f32 to vector<16x32xf32>
    %106 = arith.subf %75, %105 : vector<16x32xf32>
    %107 = vector.broadcast %104 : f32 to vector<16x32xf32>
    %108 = arith.subf %75, %107 : vector<16x32xf32>
    %109 = arith.mulf %106, %108 : vector<16x32xf32>
    %110 = vector.shape_cast %109 : vector<16x32xf32> to vector<1x16x32xf32>
    %cst_58 = arith.constant dense<0.000000e+00> : vector<1xf32>
    %111 = vector.multi_reduction <add>, %110, %cst_58 [1, 2] : vector<1x16x32xf32> to vector<1xf32>
    %112 = vector.shape_cast %111 : vector<1xf32> to vector<1x1x1xf32>
    %113 = vector.extract %112[0, 0, 0] : f32 from vector<1x1x1xf32>
    %cst_59 = arith.constant 5.120000e+02 : f32
    %114 = arith.divf %113, %cst_59 : f32
    %115 = vector.broadcast %104 : f32 to vector<16x32xf32>
    %116 = arith.subf %75, %115 : vector<16x32xf32>
    %cst_60 = arith.constant 9.99999974E-6 : f32
    %117 = arith.addf %114, %cst_60 : f32
    %118 = math.rsqrt %117 : f32
    %119 = vector.broadcast %118 : f32 to vector<16x32xf32>
    %120 = arith.mulf %116, %119 : vector<16x32xf32>
    %c0_61 = arith.constant 0 : index
    %c0_62 = arith.constant 0 : index
    %c0_63 = arith.constant 0 : index
    %121 = vector.load %arg14[%c0_61, %c0_62, %c0_63] : memref<1x16x32xf32, #tpu.memory_space<vmem>>, vector<1x16x32xf32>
    %122 = vector.shape_cast %121 : vector<1x16x32xf32> to vector<16x32xf32>
    %123 = vector.shape_cast %120 : vector<16x32xf32> to vector<1x16x32xf32>
    tpu.vector_store %arg14[%c0_61, %c0_62, %c0_63], %123 {strides = array<i32>} : memref<1x16x32xf32, #tpu.memory_space<vmem>>, vector<1x16x32xf32>,
    return
  }
  func.func @transform_0(%arg0: i32) -> (i32, i32, i32) {
    %c0_i32 = arith.constant 0 : i32
    %c0_i32_0 = arith.constant 0 : i32
    %c0_i32_1 = arith.constant 0 : i32
    return %arg0, %c0_i32, %c0_i32_0 : i32, i32, i32
  }
  func.func @transform_1(%arg0: i32) -> (i32, i32, i32) {
    %c0_i32 = arith.constant 0 : i32
    %c0_i32_0 = arith.constant 0 : i32
    %c0_i32_1 = arith.constant 0 : i32
    return %arg0, %c0_i32, %c0_i32_0 : i32, i32, i32
  }
  func.func @transform_2(%arg0: i32) -> (i32, i32, i32) {
    %c0_i32 = arith.constant 0 : i32
    %c0_i32_0 = arith.constant 0 : i32
    %c0_i32_1 = arith.constant 0 : i32
    return %arg0, %c0_i32, %c0_i32_0 : i32, i32, i32
  }
  func.func @transform_3(%arg0: i32) -> (i32, i32, i32) {
    %c0_i32 = arith.constant 0 : i32
    %c0_i32_0 = arith.constant 0 : i32
    %c0_i32_1 = arith.constant 0 : i32
    return %arg0, %c0_i32, %c0_i32_0 : i32, i32, i32
  }
  func.func @transform_4(%arg0: i32) -> (i32, i32, i32) {
    %c0_i32 = arith.constant 0 : i32
    %c0_i32_0 = arith.constant 0 : i32
    %c0_i32_1 = arith.constant 0 : i32
    return %arg0, %c0_i32, %c0_i32_0 : i32, i32, i32
  }
  func.func @transform_5(%arg0: i32) -> (i32, i32, i32) {
    %c0_i32 = arith.constant 0 : i32
    %c0_i32_0 = arith.constant 0 : i32
    %c0_i32_1 = arith.constant 0 : i32
    return %arg0, %c0_i32, %c0_i32_0 : i32, i32, i32
  }
  func.func @transform_6(%arg0: i32) -> (i32, i32) {
    %c0_i32 = arith.constant 0 : i32
    %c0_i32_0 = arith.constant 0 : i32
    %c0_i32_1 = arith.constant 0 : i32
    return %c0_i32, %c0_i32_0 : i32, i32
  }
  func.func @transform_7(%arg0: i32) -> (i32, i32) {
    %c0_i32 = arith.constant 0 : i32
    %c0_i32_0 = arith.constant 0 : i32
    %c0_i32_1 = arith.constant 0 : i32
    return %c0_i32, %c0_i32_0 : i32, i32
  }
  func.func @transform_8(%arg0: i32) -> (i32, i32) {
    %c0_i32 = arith.constant 0 : i32
    %c0_i32_0 = arith.constant 0 : i32
    %c0_i32_1 = arith.constant 0 : i32
    return %c0_i32, %c0_i32_0 : i32, i32
  }
  func.func @transform_9(%arg0: i32) -> (i32, i32) {
    %c0_i32 = arith.constant 0 : i32
    %c0_i32_0 = arith.constant 0 : i32
    %c0_i32_1 = arith.constant 0 : i32
    return %c0_i32, %c0_i32_0 : i32, i32
  }
  func.func @transform_10(%arg0: i32) -> (i32, i32) {
    %c0_i32 = arith.constant 0 : i32
    %c0_i32_0 = arith.constant 0 : i32
    %c0_i32_1 = arith.constant 0 : i32
    return %c0_i32, %c0_i32_0 : i32, i32
  }
  func.func @transform_11(%arg0: i32) -> (i32, i32) {
    %c0_i32 = arith.constant 0 : i32
    %c0_i32_0 = arith.constant 0 : i32
    %c0_i32_1 = arith.constant 0 : i32
    return %c0_i32, %c0_i32_0 : i32, i32
  }
  func.func @transform_12(%arg0: i32) -> (i32, i32, i32) {
    %c0_i32 = arith.constant 0 : i32
    %c0_i32_0 = arith.constant 0 : i32
    %c0_i32_1 = arith.constant 0 : i32
    return %arg0, %c0_i32, %c0_i32_0 : i32, i32, i32
  }
  func.func @transform_13(%arg0: i32) -> (i32, i32, i32) {
    %c0_i32 = arith.constant 0 : i32
    %c0_i32_0 = arith.constant 0 : i32
    %c0_i32_1 = arith.constant 0 : i32
    return %arg0, %c0_i32, %c0_i32_0 : i32, i32, i32
  }
  func.func @transform_14(%arg0: i32) -> (i32, i32, i32) {
    %c0_i32 = arith.constant 0 : i32
    %c0_i32_0 = arith.constant 0 : i32
    %c0_i32_1 = arith.constant 0 : i32
    return %arg0, %c0_i32, %c0_i32_0 : i32, i32, i32
  }
  func.func @transform_15(%arg0: i32) -> (i32, i32, i32) {
    %c0_i32 = arith.constant 0 : i32
    %c0_i32_0 = arith.constant 0 : i32
    %c0_i32_1 = arith.constant 0 : i32
    return %arg0, %c0_i32, %c0_i32_0 : i32, i32, i32
  }
}

</mosaic_0001>

<bundles_post_ra>
// kernel: _lambda_.1
= control target key start
LH: loop header
LB: loop body
LE: loop exit
PB: predicated region body
PF: predicated region fallthrough
CT: control target
= control target key end

     0   :  { %s1776_s18 = smov 0   ;;  %s1949_s0 = inlined_call_operand.vmem [shape: f32[2,8,32], index: 0, kind: input, shape index: {}]   ;;  %s1950_s1 = inlined_call_operand.vmem [shape: f32[2,16,32], index: 1, kind: input, shape index: {}]   ;;  %s1951_s2 = inlined_call_operand.vmem [shape: f32[2,8,1], index: 2, kind: input, shape index: {}]   ;;  %s1952_s3 = inlined_call_operand.vmem [shape: f32[2,1,16], index: 3, kind: input, shape index: {}]   ;;  %s1953_s4 = inlined_call_operand.vmem [shape: f32[2,16,1], index: 4, kind: input, shape index: {}]   ;;  %s1954_s5 = inlined_call_operand.vmem [shape: f32[2,1,8], index: 5, kind: input, shape index: {}]   ;;  %s1955_s6 = inlined_call_operand.vmem [shape: bf16[32,32], index: 6, kind: input, shape index: {}]   ;;  %s1956_s7 = inlined_call_operand.vmem [shape: bf16[32,32], index: 7, kind: input, shape index: {}]   ;;  %s1957_s8 = inlined_call_operand.vmem [shape: f32[1,32], index: 8, kind: input, shape index: {}]   ;;  %s1958_s9 = inlined_call_operand.vmem [shape: bf16[32,32], index: 9, kind: input, shape index: {}]   ;;  %s1959_s10 = inlined_call_operand.vmem [shape: bf16[32,32], index: 10, kind: input, shape index: {}]   ;;  %s1960_s11 = inlined_call_operand.vmem [shape: f32[1,32], index: 11, kind: input, shape index: {}]   ;;  %s1961_s12 = inlined_call_operand.vmem [shape: f32[2,8,32], index: 12, kind: output, shape index: {0}]   ;;  %s1962_s13 = inlined_call_operand.vmem [shape: f32[2,16,32], index: 13, kind: output, shape index: {1}]   ;;  %s1963_s14 = inlined_call_operand.vmem [shape: f32[2,8,1], index: 14, kind: output, shape index: {2}]   ;;  %s1964_s15 = inlined_call_operand.vmem [shape: f32[2,16,1], index: 15, kind: output, shape index: {3}]  }
   0x1 LB: > { %s1499_s19 = sadd.s32 4294967295, %s1691_s18   ;;  %p1503_p0 = scmp.ge.s32.totalorder %s1691_s18, 1  ;;  %s1691_s18 = sphi %s1776_s18, %s26_s18  }
   0x2   : > { %p488_p1 = scmp.lt.s32.totalorder %s1691_s18, 3 }
   0x4   : > { %p489_p2 = pnand %p1503_p0, %p488_p1 }
   0x5   : > { %p568_p3 = scmp.lt.s32.totalorder (!%p489_p2), %s1499_s19, 1  ;;  %v1693_v0 = vmov (!%p489_p2), 0.0   ;;  %vm1694_vm0 = vmmov (!%p489_p2), 0   ;;  %v1695_v1 = vmov (!%p489_p2), 0   ;;  %vm622_vm1 = vcmask (!%p489_p2), 261120  }
   0x6   : > { %492 = sbr.rel (%p489_p2) target bundleno = 2084 (0x824), region = 68  ;;  %1574 = vmatprep.subr.bf16.mxu1 (!%p489_p2), %v1693_v0  ;;  %1576 = vmatprep.mubr.msk.bf16.mxu1 (!%p489_p2), %vm1694_vm0, %v1693_v0  ;;  %vm743_vm2 = vcmask (!%p489_p2), 64512   ;;  %vm750_vm3 = vcmask (!%p489_p2), 7168   ;;  %vm826_vm4 = vcmask (!%p489_p2), 1043456   ;;  %vm739_vm5 = vcmask (!%p489_p2), 130048  }
   0x7   : > { %1659 = vset.pattern.permute.xlu0 (!%p489_p2), %v1695_v1  ;;  %1568 = vmatprep.subr.bf16.mxu0 (!%p489_p2), %v1693_v0 }
   0x8   : > { %1570 = vmatprep.mubr.msk.bf16.mxu0 (!%p489_p2), %vm1694_vm0, %v1693_v0  ;;  %1660 = vset.pattern.permute.xlu1 (!%p489_p2), %v1695_v1 }
   0xd   : > { %s1966_s19 = smov (!%p568_p3, %s1499_s19), 1 }
   0xe   : > { %s1793_s20 = sshll.u32 %s1966_s19, 3  ;;  %s1796_s21 = sshll.u32 %s1966_s19, 4 }
   0xf   : > { %s571_s24 = scalar_lea.vmem %s1949_s0, %s1793_s20  ;;  %s588_s27 = scalar_lea.vmem %s1953_s4, %s1796_s21 }
  0x10   : > { %v1802_v2 = vld [vmem:[%s571_s24] sm:$0xff]  ;;  %s576_s30 = scalar_lea.vmem %s1950_s1, %s1796_s21  ;;  %v678_v6 = vld [vmem:[%s588_s27 + $0x8] sm:$0xff]  ;;  %s591_s22 = scalar_lea.vmem %s1954_s5, %s1966_s19 }
  0x11   : > { %v1810_v3 = vpack.c.bf16 %v1802_v2, %v1802_v2  ;;  %v677_v4 = vld [vmem:[%s588_s27] sm:$0xff]  ;;  %v1820_v8 = vld [vmem:[%s576_s30 + $0x8] sm:$0xff]  ;;  %s609_s25 = scalar_lea.vmem %s1964_s15, %s1796_s21  ;;  %s580_s28 = scalar_lea.vmem %s1951_s2, %s1793_s20 }
  0x12   : > { %681 = vperm.xlu0 %1659, %v677_v4   ;;  %v1818_v7 = vld [vmem:[%s576_s30] sm:$0xff]  ;;  %s583_s16 = scalar_lea.vmem %s1952_s3, %s1966_s19  ;;  %s595_s27 = scalar_lea.vmem %s1961_s12, %s1793_s20 }
  0x13   : > { %v624_v5 = vsel %vm622_vm1, %v1810_v3, 0  ;;  %v615_v9 = vpack.c.bf16 %v1820_v8, %v1818_v7  ;;  %v1519_v13 = vld [vmem:[%s591_s22] ss:$0 sm:$0xff]  ;;  %v827_v39 = vsel %vm826_vm4, %v1810_v3, 0  ;;  %s604_s22 = scalar_lea.vmem %s1963_s14, %s1793_s20 }
  0x14   : > { %1575 = vmatpush3.bf16.xpose.msra.mxu1 %v624_v5  ;;  %v616_v34 = vld [vmem:[%s580_s28] sm:$0xff]  ;;  %v1662_v5 = vld [vmem:[%s1956_s7 + $0x8] sm:$0xff]  }
  0x15   : > { %1586 = vmatprep.subr.bf16.mxu1 %v1693_v0  ;;  %v627_v10 = vsel %vm622_vm1, %v615_v9, 0  ;;  %v1517_v43 = vld [vmem:[%s583_s16] ss:$0 sm:$0xff] }
  0x16   : > { %686 = vperm.xlu0 %1659, %v678_v6   ;;  %1569 = vmatpush3.bf16.xpose.msra.mxu0 %v627_v10  ;;  %v1661_v4 = vld [vmem:[%s1956_s7] sm:$0xff]  }
  0x17   : > { %1580 = vmatprep.subr.bf16.mxu0 %v1693_v0 }
  0x1b   : > { %1577 = vmatmul.mubr.msk.bf16.vlgmr.msra.gmra.mrb[0].mxu1 %vm622_vm1, %v615_v9 }
  0x1c   : > { %1588 = vmatprep.mubr.msk.bf16.mxu1 %vm1694_vm0, %v1693_v0  ;;  %1587 = vmatpush3.bf16.msra.mxu1 %v827_v39 }
  0x1d   : > { %1571 = vmatmul.mubr.msk.bf16.vlgmr.msra.gmra.mrb[0].mxu0 %vm622_vm1, %v1810_v3  ;;  %1598 = vmatprep.subr.bf16.mxu1 %v1693_v0 }
  0x1e   : > { %1581 = vmatpush3.bf16.msra.mxu0 %v615_v9  ;;  %1582 = vmatprep.mubr.msk.bf16.mxu0 %vm1694_vm0, %v1693_v0  ;;  %v1663_v9 = vld [vmem:[%s1959_s10] sm:$0xff]  }
  0x1f   : > { %1592 = vmatprep.subr.bf16.mxu0 %v1693_v0 }
  0x91   : > { %v682_v11 = vpop.permute.xlu0 %681 }
  0x95   : > { %v687_v16 = vpop.permute.xlu0 %686 }
  0xee   : > { %v723_v12 = vpop.f32.mrb[0].mxu1 }
  0xef   : > { %v724_v14 = vadd.f32 %v723_v12, %v682_v11  ;;  %v1578_v15 = vpop.f32.mrb[1].mxu1 }
  0xf0   : > { %v726_v17 = vpop.f32.mrb[2].mxu1  ;;  %v663_v35 = vpop.f32.mrb[0].mxu0  ;;  %v1664_v15 = vld [vmem:[%s1955_s6] sm:$0xff]  }
  0xf1   : > { %v727_v18 = vadd.f32 %v726_v17, %v687_v16  ;;  %v1579_v19 = vpop.f32.mrb[3].mxu1  ;;  %v737_v20 = vadd.f32 %v1519_v13, %v724_v14  ;;  %v1572_v36 = vpop.f32.mrb[1].mxu0  ;;  %v1665_v16 = vld [vmem:[%s1959_s10 + $0x8] sm:$0xff]  }
  0xf2   : > { %v666_v37 = vpop.f32.mrb[2].mxu0 }
  0xf3   : > { %v744_v21 = vsel %vm743_vm2, %v737_v20, -inf  ;;  %v738_v22 = vadd.f32 %v1519_v13, %v727_v18  ;;  %v1573_v38 = vpop.f32.mrb[3].mxu0  ;;  %v1666_v18 = vld [vmem:[%s1955_s6 + $0x8] sm:$0xff]  }
  0xf4   : > { %745 = vmax.xlane.f32.xlu1 %v744_v21  ;;  %v1530_v38 = vld [vmem:[%s1957_s8] ss:$0 sm:$0xff] }
  0xf5   : > { %v747_v23 = vsel %vm743_vm2, %v738_v22, -inf }
  0xf8   : > { %748 = vmax.xlane.f32.xlu1 %v747_v23  ;;  %v1667_v23 = vld [vmem:[%s1958_s9] sm:$0xff]  }
 0x181   : > { %v746_v24 = vpop.xlane.xlu1 %745 }
 0x182   : > { %752 = vst.msk [vmem:[%s609_s25] sm:$0xff] %vm750_vm3, %v746_v24  ;;  %v757_v25 = vsub.f32 %v737_v20, %v746_v24  ;;  %v1668_v24 = vld [vmem:[%s1958_s9 + $0x8] sm:$0xff]  }
 0x184   : > { %v759_v26 = vmul.f32 1.442695, %v757_v25 }
 0x185   : > { %v749_v27 = vpop.xlane.xlu1 %748 }
 0x186   : > { %1669 = vpow2.f32 %v759_v26  ;;  %753 = vst.msk [vmem:[%s609_s25 + $0x8] sm:$0xff] %vm750_vm3, %v749_v27  ;;  %v758_v28 = vsub.f32 %v738_v22, %v749_v27 }
 0x188   : > { %v761_v29 = vmul.f32 1.442695, %v758_v28 }
 0x18a   : > { %1671 = vpow2.f32 %v761_v29 }
 0x190   : > { %v1670_v30 = vpop.eup %1669 }
 0x191   : > { %v769_v31 = vsel %vm743_vm2, %v1670_v30, 0.0 }
 0x192   : > { %770 = vadd.xlane.f32.xlu0 %v769_v31 }
 0x194   : > { %v1672_v32 = vpop.eup %1671 }
 0x195   : > { %v772_v33 = vsel %vm743_vm2, %v1672_v32, 0.0 }
 0x196   : > { %773 = vadd.xlane.f32.xlu1 %v772_v33 }
 0x1a7   : > { %619 = vperm.xlu1 %1660, %v616_v34  }
 0x21f   : > { %v771_v40 = vpop.xlane.xlu0 %770 }
 0x220   : > { %1673 = vrcp.f32 %v771_v40 }
 0x223   : > { %v774_v41 = vpop.xlane.xlu1 %773 }
 0x224   : > { %1675 = vrcp.f32 %v774_v41 }
 0x227   : > { %v620_v42 = vpop.permute.xlu1 %619 }
 0x228   : > { %v664_v44 = vadd.f32 %v663_v35, %v620_v42 }
 0x22a   : > { %v676_v45 = vadd.f32 %v1517_v43, %v664_v44  ;;  %v1674_v46 = vpop.eup %1673 }
 0x22b   : > { %v776_v49 = vmul.f32 %v1674_v46, %v1670_v30 }
 0x22c   : > { %v740_v47 = vsel %vm739_vm5, %v676_v45, -inf }
 0x22d   : > { %741 = vmax.xlane.f32.xlu1 %v740_v47 }
 0x22e   : > { %v1676_v48 = vpop.eup %1675 }
 0x22f   : > { %v778_v50 = vmul.f32 %v1676_v48, %v1672_v32 }
 0x231   : > { %v779_v51 = vpack.c.bf16 %v778_v50, %v776_v49 }
 0x233   : > { %1589 = vmatmul.mubr.msk.bf16.vlgmr.msra.gmra.mrb[4].mxu1 %vm743_vm2, %v779_v51 }
 0x234   : > { %1600 = vmatprep.mubr.msk.bf16.mxu1 %vm1694_vm0, %v1693_v0 }
 0x2ba   : > { %v742_v52 = vpop.xlane.xlu1 %741 }
 0x2bb   : > { %751 = vst.msk [vmem:[%s604_s22] sm:$0xff] %vm750_vm3, %v742_v52  ;;  %v754_v53 = vsub.f32 %v676_v45, %v742_v52 }
 0x2bd   : > { %v755_v54 = vmul.f32 1.442695, %v754_v53 }
 0x2bf   : > { %1677 = vpow2.f32 %v755_v54 }
 0x2c9   : > { %v1678_v55 = vpop.eup %1677 }
 0x2ca   : > { %v763_v56 = vsel %vm739_vm5, %v1678_v55, 0.0 }
 0x2cb   : > { %764 = vadd.xlane.f32.xlu0 %v763_v56  ;;  %v1537_v56 = vld [vmem:[%s1960_s11] ss:$0 sm:$0xff] }
 0x306   : > { %v863_v57 = vpop.f32.mrb[4].mxu1 }
 0x307   : > { %v1590_v58 = vpop.f32.mrb[5].mxu1 }
 0x308   : > { %v866_v59 = vpop.f32.mrb[6].mxu1 }
 0x309   : > { %v871_v60 = vpack.c.bf16 %v866_v59, %v863_v57  ;;  %v1591_v61 = vpop.f32.mrb[7].mxu1 }
 0x358   : > { %v765_v62 = vpop.xlane.xlu0 %764 }
 0x359   : > { %1679 = vrcp.f32 %v765_v62 }
 0x363   : > { %v1680_v63 = vpop.eup %1679 }
 0x364   : > { %v767_v1 = vmul.f32 %v1680_v63, %v1678_v55 }
 0x366   : > { %v768_v3 = vpack.c.bf16 %v767_v1, %v767_v1 }
 0x368   : > { %1583 = vmatmul.mubr.msk.bf16.vlgmr.msra.gmra.mrb[4].mxu0 %vm739_vm5, %v768_v3 }
 0x369   : > { %1593 = vmatpush3.bf16.msra.mxu0 %v871_v60  ;;  %1594 = vmatprep.mubr.msk.bf16.mxu0 %vm1694_vm0, %v1693_v0 }
 0x36a   : > { %1604 = vmatprep.subr.bf16.mxu0 %v1693_v0 }
 0x370   : > { %1595 = vmatmul.mubr.msk.bf16.vlgmr.msra.gmra.mrb[8].mxu0 %vm739_vm5, %v768_v3 }
 0x371   : > { %1605 = vmatpush3.bf16.msra.mxu0 %v1661_v4  ;;  %1608 = vmatprep.mubr.msk.bf16.mxu0 %vm1694_vm0, %v1693_v0 }
 0x372   : > { %1606 = vmatprep.subr.bf16.mxu0 %v1693_v0 }
 0x375   : > { %1607 = vmatpush3.bf16.msra.mxu0 %v1662_v5 }
 0x376   : > { %1620 = vmatprep.subr.bf16.mxu0 %v1693_v0 }
 0x43b   : > { %v817_v6 = vpop.f32.mrb[4].mxu0 }
 0x43c   : > { %v870_v10 = vpack.c.bf16 %v817_v6, %v817_v6  ;;  %v1584_v11 = vpop.f32.mrb[5].mxu0 }
 0x43d   : > { %v820_v12 = vpop.f32.mrb[6].mxu0 }
 0x43e   : > { %v913_v13 = vsel %vm826_vm4, %v870_v10, 0  ;;  %v1585_v14 = vpop.f32.mrb[7].mxu0  ;;  %1609 = vmatmul.mubr.msk.bf16.vlgmr.msra.gmra.mrb[12].mxu0 %vm622_vm1, %v870_v10 }
 0x43f   : > { %1599 = vmatpush3.bf16.msra.mxu1 %v913_v13  ;;  %1621 = vmatpush3.bf16.msra.mxu0 %v1663_v9 }
 0x440   : > { %1612 = vmatprep.subr.bf16.mxu1 %v1693_v0  ;;  %1622 = vmatprep.subr.bf16.mxu0 %v1693_v0 }
 0x441   : > { %1624 = vmatprep.mubr.msk.bf16.mxu0 %vm1694_vm0, %v1693_v0 }
 0x442   : > { %1601 = vmatmul.mubr.msk.bf16.vlgmr.msra.gmra.mrb[8].mxu1 %vm743_vm2, %v779_v51 }
 0x443   : > { %v906_v17 = vpop.f32.mrb[8].mxu0  ;;  %1613 = vmatpush3.bf16.msra.mxu1 %v1664_v15  ;;  %1623 = vmatpush3.bf16.msra.mxu0 %v1665_v16 }
 0x444   : > { %v1596_v19 = vpop.f32.mrb[9].mxu0  ;;  %1614 = vmatprep.subr.bf16.mxu1 %v1693_v0  ;;  %1616 = vmatprep.mubr.msk.bf16.mxu1 %vm1694_vm0, %v1693_v0  ;;  %v956_v22 = vpack.c.bf16 %v906_v17, %v906_v17 }
 0x445   : > { %v909_v20 = vpop.f32.mrb[10].mxu0 }
 0x446   : > { %v1597_v21 = vpop.f32.mrb[11].mxu0  ;;  %1625 = vmatmul.mubr.msk.bf16.vlgmr.msra.gmra.mrb[16].mxu0 %vm622_vm1, %v871_v60 }
 0x447   : > { %1615 = vmatpush3.bf16.msra.mxu1 %v1666_v18 }
 0x448   : > { %1628 = vmatprep.subr.bf16.mxu1 %v1693_v0 }
 0x44a   : > { %1617 = vmatmul.mubr.msk.bf16.vlgmr.msra.gmra.mrb[12].mxu1 %vm622_vm1, %v956_v22 }
 0x44b   : > { %1632 = vmatprep.mubr.msk.bf16.mxu1 %vm1694_vm0, %v1693_v0  ;;  %1629 = vmatpush3.bf16.msra.mxu1 %v1667_v23 }
 0x44c   : > { %1630 = vmatprep.subr.bf16.mxu1 %v1693_v0 }
 0x44f   : > { %1631 = vmatpush3.bf16.msra.mxu1 %v1668_v24 }
 0x511   : > { %v1013_v25 = vpop.f32.mrb[12].mxu0 }
 0x512   : > { %v1610_v26 = vpop.f32.mrb[13].mxu0 }
 0x513   : > { %v1016_v27 = vpop.f32.mrb[14].mxu0 }
 0x514   : > { %v1611_v28 = vpop.f32.mrb[15].mxu0 }
 0x515   : > { %v949_v29 = vpop.f32.mrb[8].mxu1 }
 0x516   : > { %v1602_v30 = vpop.f32.mrb[9].mxu1 }
 0x517   : > { %v952_v31 = vpop.f32.mrb[10].mxu1 }
 0x518   : > { %v1083_v32 = vpack.c.bf16 %v952_v31, %v949_v29  ;;  %v1603_v33 = vpop.f32.mrb[11].mxu1 }
 0x519   : > { %v1141_v34 = vpop.f32.mrb[16].mxu0 }
 0x51a   : > { %v1626_v35 = vpop.f32.mrb[17].mxu0  ;;  %1633 = vmatmul.mubr.msk.bf16.vlgmr.msra.gmra.mrb[16].mxu1 %vm622_vm1, %v1083_v32 }
 0x51b   : > { %v1144_v36 = vpop.f32.mrb[18].mxu0 }
 0x51c   : > { %v1627_v0 = vpop.f32.mrb[19].mxu0 }
 0x51d   : > { %v1068_v37 = vpop.f32.mrb[12].mxu1 }
 0x51e   : > { %v1069_v39 = vadd.f32 %v1068_v37, %v1013_v25  ;;  %v1618_v40 = vpop.f32.mrb[13].mxu1 }
 0x51f   : > { %v1071_v41 = vpop.f32.mrb[14].mxu1 }
 0x520   : > { %v1081_v42 = vadd.f32 %v1530_v38, %v1069_v39  ;;  %v1619_v43 = vpop.f32.mrb[15].mxu1 }
 0x522   : > { %v1082_v44 = vadd.f32 %v1081_v42, %v1802_v2 }
 0x524   : > { %v1215_v45 = vsel %vm622_vm1, %v1082_v44, 0.0 }
 0x525   : > { %1216 = vadd.xlane.f32.xlu0 %v1215_v45 }
 0x5b2   : > { %v1217_v46 = vpop.xlane.xlu0 %1216 }
 0x5b3   : > { %v1218_v47 = vrot.slane %v1217_v46, 4 }
 0x5b5   : > { %v1219_v48 = vadd.f32 %v1218_v47, %v1217_v46 }
 0x5b7   : > { %v1220_v49 = vrot.slane %v1219_v48, 2 }
 0x5b9   : > { %v1221_v50 = vadd.f32 %v1220_v49, %v1219_v48 }
 0x5bb   : > { %v1222_v51 = vrot.slane %v1221_v50, 1 }
 0x5bd   : > { %v1223_v52 = vadd.f32 %v1222_v51, %v1221_v50 }
 0x5bf   : > { %1636 = vpush %v1223_v52 }
 0x5ed   : > { %v1197_v53 = vpop.f32.mrb[16].mxu1 }
 0x5ee   : > { %v1198_v54 = vadd.f32 %v1197_v53, %v1141_v34  ;;  %v1634_v55 = vpop.f32.mrb[17].mxu1 }
 0x5ef   : > { %v1200_v57 = vpop.f32.mrb[18].mxu1 }
 0x5f0   : > { %v1201_v2 = vadd.f32 %v1200_v57, %v1144_v36  ;;  %v1635_v58 = vpop.f32.mrb[19].mxu1  ;;  %s1637_s16 = spop %1636  ;;  %v1211_v59 = vadd.f32 %v1537_v56, %v1198_v54 }
 0x5f1   : > { %s1227_s17 = smul.f32 0.00390625, %s1637_s16 }
 0x5f2   : > { %v1212_v60 = vadd.f32 %v1537_v56, %v1201_v2  ;;  %v1213_v3 = vadd.f32 %v1211_v59, %v1818_v7 }
 0x5f3   : > { %v1228_v61 = vstv %s1227_s17 }
 0x5f4   : > { %v1229_v62 = vsub.f32 %v1082_v44, %v1228_v61  ;;  %v1214_v63 = vadd.f32 %v1212_v60, %v1820_v8  ;;  %v1251_v6 = vsel %vm622_vm1, %v1213_v3, 0.0 }
 0x5f6   : > { %v1230_v1 = vmul.f32 %v1229_v62, %v1229_v62  ;;  %v1252_v5 = vsel %vm622_vm1, %v1214_v63, 0.0 }
 0x5f7   : > { %v1253_v9 = vadd.f32 %v1252_v5, %v1251_v6 }
 0x5f8   : > { %v1231_v4 = vsel %vm622_vm1, %v1230_v1, 0.0 }
 0x5f9   : > { %1232 = vadd.xlane.f32.xlu0 %v1231_v4 }
 0x5fd   : > { %1254 = vadd.xlane.f32.xlu0 %v1253_v9 }
 0x686   : > { %v1233_v10 = vpop.xlane.xlu0 %1232 }
 0x687   : > { %v1234_v11 = vrot.slane %v1233_v10, 4 }
 0x689   : > { %v1235_v12 = vadd.f32 %v1234_v11, %v1233_v10 }
 0x68a   : > { %v1255_v8 = vpop.xlane.xlu0 %1254 }
 0x68b   : > { %v1236_v13 = vrot.slane %v1235_v12, 2  ;;  %v1256_v7 = vrot.slane %v1255_v8, 4 }
 0x68d   : > { %v1237_v14 = vadd.f32 %v1236_v13, %v1235_v12  ;;  %v1257_v17 = vadd.f32 %v1256_v7, %v1255_v8 }
 0x68f   : > { %v1238_v15 = vrot.slane %v1237_v14, 1  ;;  %v1258_v18 = vrot.slane %v1257_v17, 2 }
 0x691   : > { %v1239_v16 = vadd.f32 %v1238_v15, %v1237_v14  ;;  %v1259_v20 = vadd.f32 %v1258_v18, %v1257_v17 }
 0x693   : > { %1638 = vpush %v1239_v16  ;;  %v1260_v21 = vrot.slane %v1259_v20, 1 }
 0x695   : > { %v1261_v23 = vadd.f32 %v1260_v21, %v1259_v20 }
 0x6c4   : > { %s1639_s19 = spop %1638 }
 0x6c5   : > { %s1243_s22 = smul.f32 0.00390625, %s1639_s19 }
 0x6c7   : > { %s1244_s23 = sadd.f32 1e-05, %s1243_s22 }
 0x6c9   : > { %v1245_v19 = vstv %s1244_s23  ;;  %s600_s23 = scalar_lea.vmem %s1962_s13, %s1796_s21 }
 0x6ca   : > { %1681 = vrsqrt.f32 %v1245_v19 }
 0x6d4   : > { %v1682_v22 = vpop.eup %1681 }
 0x6d5   : > { %1640 = vpush %v1682_v22 }
 0x6d6   : > { %1642 = vpush %v1261_v23 }
 0x706   : > { %s1641_s24 = spop %1640 }
 0x707   : > { %v1248_v24 = vstv %s1641_s24  ;;  %s1643_s28 = spop %1642 }
 0x708   : > { %v1249_v25 = vmul.f32 %v1248_v24, %v1229_v62  ;;  %s1265_s29 = smul.f32 0.001953125, %s1643_s28 }
 0x70a   : > { %1250 = vst.msk [vmem:[%s595_s27] sm:$0xff] %vm622_vm1, %v1249_v25  ;;  %v1266_v26 = vstv %s1265_s29 }
 0x70b   : > { %v1267_v27 = vsub.f32 %v1213_v3, %v1266_v26  ;;  %v1268_v28 = vsub.f32 %v1214_v63, %v1266_v26 }
 0x70d   : > { %v1269_v29 = vmul.f32 %v1267_v27, %v1267_v27  ;;  %v1270_v30 = vmul.f32 %v1268_v28, %v1268_v28 }
 0x70f   : > { %v1271_v31 = vsel %vm622_vm1, %v1269_v29, 0.0  ;;  %v1272_v32 = vsel %vm622_vm1, %v1270_v30, 0.0 }
 0x710   : > { %v1273_v33 = vadd.f32 %v1272_v32, %v1271_v31 }
 0x712   : > { %1274 = vadd.xlane.f32.xlu0 %v1273_v33 }
 0x79f   : > { %v1275_v34 = vpop.xlane.xlu0 %1274 }
 0x7a0   : > { %v1276_v35 = vrot.slane %v1275_v34, 4 }
 0x7a2   : > { %v1277_v36 = vadd.f32 %v1276_v35, %v1275_v34 }
 0x7a4   : > { %v1278_v0 = vrot.slane %v1277_v36, 2 }
 0x7a6   : > { %v1279_v37 = vadd.f32 %v1278_v0, %v1277_v36 }
 0x7a8   : > { %v1280_v38 = vrot.slane %v1279_v37, 1 }
 0x7aa   : > { %v1281_v39 = vadd.f32 %v1280_v38, %v1279_v37 }
 0x7ac   : > { %1644 = vpush %v1281_v39 }
 0x7dd   : > { %s1645_s20 = spop %1644 }
 0x7de   : > { %s1285_s30 = smul.f32 0.001953125, %s1645_s20 }
 0x7e0   : > { %s1286_s16 = sadd.f32 1e-05, %s1285_s30 }
 0x7e2   : > { %v1287_v40 = vstv %s1286_s16 }
 0x7e3   : > { %1683 = vrsqrt.f32 %v1287_v40 }
 0x7ed   : > { %v1684_v41 = vpop.eup %1683 }
 0x7ee   : > { %1646 = vpush %v1684_v41 }
 0x81f   : > { %s1647_s17 = spop %1646 }
 0x820   : > { %v1290_v42 = vstv %s1647_s17 }
 0x821   : > { %v1291_v43 = vmul.f32 %v1290_v42, %v1267_v27  ;;  %v1292_v44 = vmul.f32 %v1290_v42, %v1268_v28 }
 0x823   : > { %1293 = vst.msk [vmem:[%s600_s23] sm:$0xff] %vm622_vm1, %v1291_v43  ;;  %1294 = vst.msk [vmem:[%s600_s23 + $0x8] sm:$0xff] %vm622_vm1, %v1292_v44 }
 0x824 PF: > { %s26_s18 = sadd.s32 1, %s1691_s18  }
 0x825   : > { %p23_p4 = scmp.ge.s32.totalorder %s26_s18, 4  }
 0x827   :  { %25 = sbr.rel (!%p23_p4) target bundleno = 1 (0x1), region = 149 }

</bundles_post_ra>
